<compile_context>
chip_gen: v6e
topology: v6e:2x2x1
jax: 0.10.0
libtpu: 0.0.40
codegen_flags: <defaults>
</compile_context>

<pallas_src>
from functools import partial

import jax
import jax.numpy as jnp
from jax.experimental import pallas as pl
from jax.experimental.pallas import tpu as pltpu

_LANES = 1024                   # 8 * 128 -> full-vreg rows, unmasked stores
_TILE_BYTES = 8 << 20           # ~8 MiB per block (per buffer), any dtype
_VMEM_LIMIT_BYTES = 48 << 20    # explicit scoped-VMEM limit (resident ~32 MiB)


def _adjust_gamma_kernel(gamma_ref, gain_ref, x_ref, o_ref):
    # gamma_ref / gain_ref: f32 (B,) scalar-prefetch tables (SMEM).
    # x_ref / o_ref: VMEM block (1, row_tile, 1024) of the flattened image.
    b = pl.program_id(1)
    g = gamma_ref[b]
    k = gain_ref[b]

    xf = x_ref[...].astype(jnp.float32)

    # Fast path: gamma == 1 is pure VPU work (no EUP transcendentals).
    @pl.when(g == 1.0)
    def _():
        o_ref[...] = jnp.clip(k * xf, 0.0, 1.0).astype(o_ref.dtype)

    # gamma == 0: pow(x, 0) == 1 for every x (matches torch.pow) -> constant.
    @pl.when(g == 0.0)
    def _():
        o_ref[...] = jnp.clip(k * jnp.ones_like(xf), 0.0, 1.0).astype(o_ref.dtype)

    # General path (gamma > 0, gamma != 1): exp(g * log(x)) == pow(x, g) for
    # x in [0, 1] (x == 0 -> exp(-inf) == 0).  Inputs outside [0, 1] below 0
    # yield NaN, same as torch.pow with a non-integer exponent.
    @pl.when(jnp.logical_and(g != 1.0, g != 0.0))
    def _():
        y = k * jnp.exp(g * jnp.log(xf))
        o_ref[...] = jnp.clip(y, 0.0, 1.0).astype(o_ref.dtype)


@partial(jax.jit, static_argnames=("row_tile",))
def adjust_gamma(x, gamma, gain=1.0, *, row_tile=None):
    """Pallas TPU equivalent of kornia's adjust_gamma.

    x:     (B, *spatial) image, expected in [0, 1]
    gamma: float or array broadcastable to (B,)  (non-negative, like kornia)
    gain:  float or array broadcastable to (B,)
    row_tile: optional override of the row-tile size (testing / tuning only).
    """
    # TODO(synk): kornia's host-side ValueError for negative gamma/gain is not
    # reproduced (data-dependent raise has no clean in-kernel equivalent).
    B = x.shape[0]
    P = 1
    for d in x.shape[1:]:
        P *= d

    # Keep gamma/gain in f32 (no round-trip through x.dtype, e.g. bf16).
    gamma_v = jnp.broadcast_to(jnp.asarray(gamma, jnp.float32).reshape(-1), (B,))
    gain_v = jnp.broadcast_to(jnp.asarray(gain, jnp.float32).reshape(-1), (B,))

    rows = pl.cdiv(P, _LANES)
    p_pad = rows * _LANES

    x_flat = x.reshape(B, P)
    if p_pad != P:
        # Only lane-padding up to the next multiple of 1024 (pad with 1.0 so
        # log/exp stay finite); no row padding, so this is skipped entirely
        # whenever P % 1024 == 0.
        x_flat = jnp.pad(x_flat, ((0, 0), (0, p_pad - P)), constant_values=1.0)
    x_3d = x_flat.reshape(B, rows, _LANES)

    if row_tile is None:
        dtype_bytes = jnp.dtype(x.dtype).itemsize
        row_tile = max(8, _TILE_BYTES // (_LANES * dtype_bytes))
    row_tile = min(int(row_tile), rows)
    if row_tile < rows:
        # (8, 128) rule: non-full second-to-last block dim must be a multiple of 8.
        row_tile = max(8, (row_tile // 8) * 8)

    # Big parallel axis first so megacore (v7x) splits the row-tile axis.
    grid = (pl.cdiv(rows, row_tile), B)

    out = pl.pallas_call(
        _adjust_gamma_kernel,
        out_shape=jax.ShapeDtypeStruct((B, rows, _LANES), x.dtype),
        grid_spec=pltpu.PrefetchScalarGridSpec(
            num_scalar_prefetch=2,  # gamma, gain -> SMEM before the grid runs
            grid=grid,
            in_specs=[
                pl.BlockSpec((1, row_tile, _LANES),
                             lambda t, b, gamma, gain: (b, t, 0)),
            ],
            out_specs=pl.BlockSpec((1, row_tile, _LANES),
                                   lambda t, b, gamma, gain: (b, t, 0)),
        ),
        compiler_params=pltpu.CompilerParams(
            dimension_semantics=("parallel", "parallel"),
            vmem_limit_bytes=_VMEM_LIMIT_BYTES,
        ),
    )(gamma_v, gain_v, x_3d)

    out_flat = out.reshape(B, p_pad)
    if p_pad != P:
        out_flat = out_flat[:, :P]
    return out_flat.reshape(x.shape)


def _ref_adjust_gamma(x, gamma, gain=1.0):
    B = x.shape[0]
    bshape = (B,) + (1,) * (x.ndim - 1)
    g = jnp.broadcast_to(jnp.asarray(gamma, jnp.float32).reshape(-1), (B,)).reshape(bshape)
    k = jnp.broadcast_to(jnp.asarray(gain, jnp.float32).reshape(-1), (B,)).reshape(bshape)
    y = k * jnp.power(x.astype(jnp.float32), g)
    return jnp.clip(y, 0.0, 1.0).astype(x.dtype)


if __name__ == "__main__":
    key = jax.random.PRNGKey(0)
    k1, k2, k3, k4 = jax.random.split(key, 4)

    # Case 1: P = C*H*W = 1024 exactly (no padding); exercises the gamma == 1
    # fast path (b=0) and the general exp/log path (b=1).
    x1 = jax.random.uniform(k1, (2, 4, 16, 16), dtype=jnp.float32)
    gamma1 = jnp.array([1.0, 2.0], dtype=jnp.float32)
    gain1 = jnp.array([2.0, 0.5], dtype=jnp.float32)
    out1 = jax.block_until_ready(adjust_gamma(x1, gamma1, gain1))
    ref1 = _ref_adjust_gamma(x1, gamma1, gain1)
    assert out1.shape == x1.shape and out1.dtype == x1.dtype
    assert jnp.allclose(out1, ref1, atol=1e-5, rtol=1e-5)

    # Case 2: odd spatial size -> lane-padding path (P = 390, padded to 1024).
    x2 = jax.random.uniform(k2, (2, 3, 10, 13), dtype=jnp.float32)
    gamma2 = jnp.array([0.5, 2.2], dtype=jnp.float32)
    gain2 = jnp.array([1.0, 1.5], dtype=jnp.float32)
    out2 = jax.block_until_ready(adjust_gamma(x2, gamma2, gain2))
    ref2 = _ref_adjust_gamma(x2, gamma2, gain2)
    assert out2.shape == x2.shape and out2.dtype == x2.dtype
    assert jnp.allclose(out2, ref2, atol=1e-5, rtol=1e-5)

    # Case 3: gamma == 0 fast path + partial trailing row block
    # (rows = 12, row_tile = 8 -> final block covers only 4 rows).
    x3 = jax.random.uniform(k3, (1, 3, 64, 64), dtype=jnp.float32)
    out3 = jax.block_until_ready(adjust_gamma(x3, 0.0, 0.7, row_tile=8))
    ref3 = _ref_adjust_gamma(x3, 0.0, 0.7)
    assert out3.shape == x3.shape and out3.dtype == x3.dtype
    assert jnp.allclose(out3, ref3, atol=1e-5, rtol=1e-5)

    # Case 4: bf16 input (byte-based tiling picks a wider row tile; f32 compute).
    x4 = jax.random.uniform(k4, (2, 4, 16, 16), dtype=jnp.float32).astype(jnp.bfloat16)
    gamma4 = jnp.array([1.7, 0.4], dtype=jnp.float32)
    out4 = jax.block_until_ready(adjust_gamma(x4, gamma4, 1.2))
    ref4 = _ref_adjust_gamma(x4, gamma4, 1.2)
    assert out4.shape == x4.shape and out4.dtype == x4.dtype
    assert jnp.allclose(out4.astype(jnp.float32), ref4.astype(jnp.float32),
                        atol=2e-2, rtol=2e-2)

    print("KERNEL_OK")
</pallas_src>

<mosaic_0001>
module attributes {stable_mosaic.version = 11 : i64} {
  func.func @_adjust_gamma_kernel(%arg0: i32, %arg1: i32, %arg2: memref<2xf32, #tpu.memory_space<smem>>, %arg3: memref<2xf32, #tpu.memory_space<smem>>, %arg4: memref<1x1x1024xf32, #tpu.memory_space<vmem>>, %arg5: memref<1x1x1024xf32, #tpu.memory_space<vmem>>) attributes {dimension_semantics = [#tpu.dimension_semantics<parallel>, #tpu.dimension_semantics<parallel>], iteration_bounds = array<i64: 1, 2>, scalar_prefetch = 2 : i64, scratch_operands = 0 : i64, tpu.core_type = #tpu.core_type<tc>, window_params = [{transform_indices = @transform_0, window_bounds = array<i64: 1, 1, 1024>}, {transform_indices = @transform_1, window_bounds = array<i64: 1, 1, 1024>}]} {
    %0 = arith.index_cast %arg1 : i32 to index
    %1 = memref.load %arg2[%0] : memref<2xf32, #tpu.memory_space<smem>>
    %2 = arith.index_cast %arg1 : i32 to index
    %3 = memref.load %arg3[%2] : memref<2xf32, #tpu.memory_space<smem>>
    %c0 = arith.constant 0 : index
    %c0_0 = arith.constant 0 : index
    %c0_1 = arith.constant 0 : index
    %4 = vector.load %arg4[%c0, %c0_0, %c0_1] : memref<1x1x1024xf32, #tpu.memory_space<vmem>>, vector<1x1x1024xf32>
    %cst = arith.constant 1.000000e+00 : f32
    %5 = arith.cmpf oeq, %1, %cst : f32
    %6 = arith.extui %5 : i1 to i32
    %c0_i32 = arith.constant 0 : i32
    %7 = arith.cmpi ne, %6, %c0_i32 : i32
    scf.if %7 {
      %16 = vector.broadcast %3 : f32 to vector<1x1x1024xf32>
      %17 = arith.mulf %16, %4 : vector<1x1x1024xf32>
      %cst_7 = arith.constant 0.000000e+00 : f32
      %cst_8 = arith.constant 1.000000e+00 : f32
      %18 = vector.broadcast %cst_7 : f32 to vector<1x1x1024xf32>
      %19 = arith.maximumf %18, %17 : vector<1x1x1024xf32>
      %20 = vector.broadcast %cst_8 : f32 to vector<1x1x1024xf32>
      %21 = arith.minimumf %20, %19 : vector<1x1x1024xf32>
      %c0_9 = arith.constant 0 : index
      %c0_10 = arith.constant 0 : index
      %c0_11 = arith.constant 0 : index
      %22 = vector.load %arg5[%c0_9, %c0_10, %c0_11] : memref<1x1x1024xf32, #tpu.memory_space<vmem>>, vector<1x1x1024xf32>
      tpu.vector_store %arg5[%c0_9, %c0_10, %c0_11], %21 {strides = array<i32>} : memref<1x1x1024xf32, #tpu.memory_space<vmem>>, vector<1x1x1024xf32>,
    } else {
    }
    %cst_2 = arith.constant 0.000000e+00 : f32
    %8 = arith.cmpf oeq, %1, %cst_2 : f32
    %9 = arith.extui %8 : i1 to i32
    %c0_i32_3 = arith.constant 0 : i32
    %10 = arith.cmpi ne, %9, %c0_i32_3 : i32
    scf.if %10 {
      %cst_7 = arith.constant 1.000000e+00 : f32
      %16 = vector.broadcast %cst_7 : f32 to vector<1x1x1024xf32>
      %17 = vector.broadcast %3 : f32 to vector<1x1x1024xf32>
      %18 = arith.mulf %17, %16 : vector<1x1x1024xf32>
      %cst_8 = arith.constant 0.000000e+00 : f32
      %cst_9 = arith.constant 1.000000e+00 : f32
      %19 = vector.broadcast %cst_8 : f32 to vector<1x1x1024xf32>
      %20 = arith.maximumf %19, %18 : vector<1x1x1024xf32>
      %21 = vector.broadcast %cst_9 : f32 to vector<1x1x1024xf32>
      %22 = arith.minimumf %21, %20 : vector<1x1x1024xf32>
      %c0_10 = arith.constant 0 : index
      %c0_11 = arith.constant 0 : index
      %c0_12 = arith.constant 0 : index
      %23 = vector.load %arg5[%c0_10, %c0_11, %c0_12] : memref<1x1x1024xf32, #tpu.memory_space<vmem>>, vector<1x1x1024xf32>
      tpu.vector_store %arg5[%c0_10, %c0_11, %c0_12], %22 {strides = array<i32>} : memref<1x1x1024xf32, #tpu.memory_space<vmem>>, vector<1x1x1024xf32>,
    } else {
    }
    %cst_4 = arith.constant 1.000000e+00 : f32
    %11 = arith.cmpf one, %1, %cst_4 : f32
    %cst_5 = arith.constant 0.000000e+00 : f32
    %12 = arith.cmpf one, %1, %cst_5 : f32
    %13 = arith.andi %11, %12 : i1
    %14 = arith.extui %13 : i1 to i32
    %c0_i32_6 = arith.constant 0 : i32
    %15 = arith.cmpi ne, %14, %c0_i32_6 : i32
    scf.if %15 {
      %16 = math.log %4 : vector<1x1x1024xf32>
      %17 = vector.broadcast %1 : f32 to vector<1x1x1024xf32>
      %18 = arith.mulf %17, %16 : vector<1x1x1024xf32>
      %19 = math.exp %18 : vector<1x1x1024xf32>
      %20 = vector.broadcast %3 : f32 to vector<1x1x1024xf32>
      %21 = arith.mulf %20, %19 : vector<1x1x1024xf32>
      %cst_7 = arith.constant 0.000000e+00 : f32
      %cst_8 = arith.constant 1.000000e+00 : f32
      %22 = vector.broadcast %cst_7 : f32 to vector<1x1x1024xf32>
      %23 = arith.maximumf %22, %21 : vector<1x1x1024xf32>
      %24 = vector.broadcast %cst_8 : f32 to vector<1x1x1024xf32>
      %25 = arith.minimumf %24, %23 : vector<1x1x1024xf32>
      %c0_9 = arith.constant 0 : index
      %c0_10 = arith.constant 0 : index
      %c0_11 = arith.constant 0 : index
      %26 = vector.load %arg5[%c0_9, %c0_10, %c0_11] : memref<1x1x1024xf32, #tpu.memory_space<vmem>>, vector<1x1x1024xf32>
      tpu.vector_store %arg5[%c0_9, %c0_10, %c0_11], %25 {strides = array<i32>} : memref<1x1x1024xf32, #tpu.memory_space<vmem>>, vector<1x1x1024xf32>,
    } else {
    }
    return
  }
  func.func @transform_0(%arg0: i32, %arg1: i32, %arg2: memref<2xf32, #tpu.memory_space<smem>>, %arg3: memref<2xf32, #tpu.memory_space<smem>>) -> (i32, i32, i32) {
    %c0_i32 = arith.constant 0 : i32
    %c0_i32_0 = arith.constant 0 : i32
    return %arg1, %arg0, %c0_i32 : i32, i32, i32
  }
  func.func @transform_1(%arg0: i32, %arg1: i32, %arg2: memref<2xf32, #tpu.memory_space<smem>>, %arg3: memref<2xf32, #tpu.memory_space<smem>>) -> (i32, i32, i32) {
    %c0_i32 = arith.constant 0 : i32
    %c0_i32_0 = arith.constant 0 : i32
    return %arg1, %arg0, %c0_i32 : i32, i32, i32
  }
}

</mosaic_0001>

<bundles_post_ra>
// kernel: adjust_gamma.1
= control target key start
LH: loop header
LB: loop body
LE: loop exit
PB: predicated region body
PF: predicated region fallthrough
CT: control target
= control target key end

     0   :  { %s440_s0 = inlined_call_operand.vmem [shape: f32[2], index: 0, kind: input, shape index: {}]   ;;  %s441_s2 = inlined_call_operand.vmem [shape: f32[2,1,1024], index: 2, kind: input, shape index: {}]   ;;  %s442_s3 = inlined_call_operand.vmem [shape: f32[2,1,1024], index: 3, kind: output, shape index: {}]   ;;  %s443_s1 = inlined_call_operand.vmem [shape: f32[2], index: 1, kind: input, shape index: {}]  }
   0x1   :  { %s8_s14 = sshll.u32 %s440_s0, 4  ;;  %s12_s17 = sshll.u32 %s443_s1, 4  ;;  %s9_s14 = int_to_ptr.vmem [resolvable:$true] %s8_s14  ;;  %s13_s17 = int_to_ptr.vmem [resolvable:$true] %s12_s17 }
   0x2   :  { %s319_s18 = scalar_lea.vmem %s9_s14, 16  ;;  %p324_p1 = scmp.lt.s32.totalorder %s9_s14, %s9_s14 }
   0x3   :  { %p320_p0 = scmp.ne.s32.totalorder %s9_s14, %s319_s18  ;;  %p325_p2 = scmp.lt.s32.totalorder %s319_s18, %s319_s18 }
   0x5   :  { %p326_p3 = por %p325_p2, %p324_p1 }
   0x7   :  { %p327_p4 = pnand %p326_p3, %p320_p0 }
   0x9   :  { %330 = shalt.err (!%p327_p4)  }
   0xa   :  { %s369_s19 = smov [#allocation3]   ;;  %s331_s20 = scalar_lea.vmem %s13_s17, 16 }
   0xb   :  { %11 = dma.vmem_to_smem %s9_s14, 16, %s369_s19, [#allocation2] }
   0xc   :  { %p332_p5 = scmp.ne.s32.totalorder %s13_s17, %s331_s20  ;;  %p336_p6 = scmp.lt.s32.totalorder %s13_s17, %s13_s17 }
   0xd   :  { %p337_p7 = scmp.lt.s32.totalorder %s331_s20, %s331_s20 }
   0xf   :  { %p338_p8 = por %p337_p7, %p336_p6 }
  0x11   :  { %p339_p9 = pnand %p338_p8, %p332_p5 }
  0x13   :  { %342 = shalt.err (!%p339_p9)  }
  0x14   :  { %s370_s0 = smov [#allocation4]  }
  0x15   :  { %15 = dma.vmem_to_smem %s13_s17, 16, %s370_s0, [#allocation2] }
  0x16   :  { %355 = dma.done.wait [#allocation2], 32 }
  0x17   :  { %356 = vsyncadd [#allocation2], 4294967264 }
  0x18   :  { %17 = sfence }
  0x19   :  { %s397_s1 = smov 0   ;;  %s399_s21 = smov 0  }
  0x1a   :  { %s401_s22 = smov 0  }
  0x1b LB: > { %s32_s23 = sadd.s32 1, %s363_s21  ;;  %p284_p10 = scmp.ge.s32.totalorder %s367_s22, 1  ;;  %s367_s22 = sphi %s401_s22, %s23_s22   ;;  %s363_s21 = sphi %s399_s21, %s445_s21   ;;  %s359_s1 = sphi %s397_s1, %s444_s1  }
  0x1c   : > { %p33_p11 = scmp.ge.s32.totalorder %s32_s23, 2  ;;  %p118_p12 = scmp.lt.s32.totalorder %s367_s22, 3 }
  0x1e   : > { %s447_s23 = smov (%p33_p11, %s32_s23), 0  ;;  %p119_p13 = pnand %p284_p10, %p118_p12 }
  0x1f   : > { %p144_p0 = scmp.lt.s32.totalorder (!%p119_p13), %s359_s1, 1  ;;  %s160_s24 = sld [smem:[#allocation3 + %s359_s1]] (!%p119_p13) }
  0x20   : > { %122 = sbr.rel (%p119_p13) target bundleno = 105 (0x69), region = 24  ;;  %s415_s25 = sld [smem:[#allocation4 + %s359_s1]] (!%p119_p13) }
  0x25   : > { %s449_s1 = smov (!%p144_p0, %s359_s1), 1  ;;  %p163_p1 = scmp.eq.f32.partialorder %s160_s24, 1.0 }
  0x26   : > { %s285_s26 = sshll.u32 %s449_s1, 3  ;;  %v167_v1 = vstv (%p163_p1), %s415_s25 }
  0x27   : > { %s151_s29 = scalar_lea.vmem %s441_s2, %s285_s26  ;;  %s423_s5 = scalar_lea.vmem %s442_s3, %s285_s26 }
  0x28   : > { %v162_v0 = vld [vmem:[%s151_s29] sm:$0xff]  ;;  %166 = sbr.rel (!%p163_p1) target bundleno = 48 (0x30), region = 28 }
  0x29   : > { %v168_v2 = vmul.f32 (%p163_p1), %v167_v1, %v162_v0 }
  0x2b   : > { %v169_v3 = vmax.f32 (%p163_p1), %v168_v2, 0.0 }
  0x2d   : > { %v170_v4 = vmin.f32 %v169_v3, 1.0 }
  0x2f   : > { %171 = vst [vmem:[%s423_s5] sm:$0xff] %v170_v4 }
  0x30 PF: > { %p172_p2 = scmp.eq.f32.partialorder %s160_s24, 0.0 }
  0x31   : > { %v176_v5 = vstv (%p172_p2), %s415_s25 }
  0x32   : > { %175 = sbr.rel (!%p172_p2) target bundleno = 55 (0x37), region = 32  ;;  %v177_v6 = vmax.f32 (%p172_p2), %v176_v5, 0.0 }
  0x34   : > { %v178_v7 = vmin.f32 (%p172_p2), %v177_v6, 1.0 }
  0x36   : > { %179 = vst [vmem:[%s423_s5] sm:$0xff] (%p172_p2), %v178_v7 }
  0x37 PF: > { %p180_p3 = scmp.ne.f32.partialorder %s160_s24, 1.0  ;;  %p181_p4 = scmp.ne.f32.partialorder %s160_s24, 0.0 }
  0x39   : > { %p182_p5 = pnand %p181_p4, %p180_p3 }
  0x3b   : > { %185 = sbr.rel (%p182_p5) target bundleno = 105 (0x69), region = 36 }
  0x40   : > { %315 = vlog2.f32 %v162_v0  ;;  %v188_v9 = vstv %s160_s24  ;;  %v192_v13 = vstv %s415_s25 }
  0x4d   : > { %v316_v8 = vpop.eup %315 }
  0x4e   : > { %v187_v10 = vmul.f32 0.6931472, %v316_v8 }
  0x50   : > { %v189_v11 = vmul.f32 %v188_v9, %v187_v10 }
  0x52   : > { %v190_v12 = vmul.f32 1.442695, %v189_v11 }
  0x54   : > { %317 = vpow2.f32 %v190_v12 }
  0x61   : > { %v318_v14 = vpop.eup %317 }
  0x62   : > { %v193_v15 = vmul.f32 %v318_v14, %v192_v13 }
  0x64   : > { %v194_v16 = vmax.f32 %v193_v15, 0.0 }
  0x66   : > { %v195_v17 = vmin.f32 %v194_v16, 1.0 }
  0x68   : > { %196 = vst [vmem:[%s423_s5] sm:$0xff] %v195_v17 }
  0x69 PF: > { %s23_s22 = sadd.s32 1, %s367_s22   ;;  %s444_s1 = smov %s363_s21 }
  0x6a   : > { %p20_p6 = scmp.ge.s32.totalorder %s23_s22, 4   ;;  %s445_s21 = smov %s447_s23 }
  0x6c   :  { %22 = sbr.rel (!%p20_p6) target bundleno = 27 (0x1b), region = 66 }

</bundles_post_ra>
